<compile_context>
chip_gen: v7x
topology: tpu7x:2x2x1
jax: 0.10.0
libtpu: 0.0.40
codegen_flags: <defaults>
</compile_context>

<pallas_src>
import functools

import jax
import jax.numpy as jnp
from jax.experimental import pallas as pl
from jax.experimental.pallas import tpu as pltpu

_NL = 6     # number of linear layers
_F = 20     # padded feature width (max of all in/out dims)
_IN = 2     # network input features
_OUT = 2    # network output classes


def mlp_kernel(x_ref, w_ref, b_ref, out_ref):
    """One batch tile of the 6-layer MLP; batch lives on the lane (last) axis.

    x_ref:   [2, BB]       inputs (features x batch-tile)
    w_ref:   [6, 20, 20]   packed weights, torch layout [out, in], zero padded
    b_ref:   [6, 20, 1]    packed biases, zero padded
    out_ref: [2, BB]       log-softmax outputs
    """
    x = x_ref[...]                                     # [2, BB]

    # fc1 (contraction K=2): two broadcast FMAs on the VPU, no MXU push.
    w1 = w_ref[0]                                      # [20, 20] (only [:, :2] used)
    h = w1[:, 0:1] * x[0:1, :] + w1[:, 1:2] * x[1:2, :] + b_ref[0]
    h = jnp.maximum(h, 0.0)                            # [20, BB]

    # fc2..fc5: 20x20 matmuls on the MXU with f32 accumulation (unrolled).
    for i in range(1, 5):
        h = jnp.dot(w_ref[i], h, preferred_element_type=jnp.float32) + b_ref[i]
        h = jnp.maximum(h, 0.0)

    # fc6: use the zero-padded [20,20] tile; only rows 0..1 are meaningful.
    z_full = jnp.dot(w_ref[5], h, preferred_element_type=jnp.float32) + b_ref[5]
    z0 = z_full[0:1, :]                                # [1, BB]
    z1 = z_full[1:2, :]                                # [1, BB]

    # 2-class log_softmax, purely elementwise (no cross-lane/XLU reduction).
    m = jnp.maximum(z0, z1)
    lse = m + jnp.log(jnp.exp(z0 - m) + jnp.exp(z1 - m))   # [1, BB]
    out_ref[...] = (z_full[0:_OUT, :] - lse).astype(out_ref.dtype)


@functools.partial(jax.jit, static_argnames=("block_b",))
def net_forward(x, w_pack, b_pack, *, block_b=512):
    """x: [B, 2] float32. w_pack: [6,20,20], b_pack: [6,20,1] (see pack_params)."""
    B, f_in = x.shape
    assert f_in == _IN
    # Lane-dense tile (multiple of 128) but never bigger than the padded batch.
    bb = min(block_b, ((B + 127) // 128) * 128)
    b_pad = pl.cdiv(B, bb) * bb

    # Transpose to batch-on-lanes and zero-pad the batch to a tile multiple.
    x_t = jnp.zeros((_IN, b_pad), jnp.float32).at[:, :B].set(
        x.astype(jnp.float32).T)

    flops = 2 * b_pad * (_IN * _F + 4 * _F * _F + _F * _OUT)
    bytes_accessed = 4 * (x_t.size + _OUT * b_pad + w_pack.size + b_pack.size)
    cost = pl.CostEstimate(flops=flops,
                           transcendentals=3 * b_pad,
                           bytes_accessed=bytes_accessed)

    out_t = pl.pallas_call(
        mlp_kernel,
        out_shape=jax.ShapeDtypeStruct((_OUT, b_pad), jnp.float32),
        grid=(b_pad // bb,),
        in_specs=[
            pl.BlockSpec((_IN, bb), lambda i: (0, i)),          # x tile
            pl.BlockSpec((_NL, _F, _F), lambda i: (0, 0, 0)),   # weights (resident)
            pl.BlockSpec((_NL, _F, 1), lambda i: (0, 0, 0)),    # biases  (resident)
        ],
        out_specs=pl.BlockSpec((_OUT, bb), lambda i: (0, i)),
        compiler_params=pltpu.CompilerParams(
            dimension_semantics=("parallel",)),
        cost_estimate=cost,
    )(x_t, w_pack, b_pack)

    return out_t[:, :B].T


def init_params(key):
    """PyTorch-default-style init: U(-1/sqrt(fan_in), 1/sqrt(fan_in)).
    Weights in torch layout [out, in], biases [out]."""
    dims = [(2, 20), (20, 20), (20, 20), (20, 20), (20, 20), (20, 2)]
    params = []
    for fan_in, fan_out in dims:
        key, kw, kb = jax.random.split(key, 3)
        bound = 1.0 / jnp.sqrt(float(fan_in))
        w = jax.random.uniform(kw, (fan_out, fan_in), jnp.float32, -bound, bound)
        b = jax.random.uniform(kb, (fan_out,), jnp.float32, -bound, bound)
        params.append((w, b))
    return params


def pack_params(params):
    """Pack the 6 (w, b) pairs into two zero-padded arrays for a single DMA each."""
    w_pack = jnp.zeros((_NL, _F, _F), jnp.float32)
    b_pack = jnp.zeros((_NL, _F, 1), jnp.float32)
    for i, (w, b) in enumerate(params):
        o, k = w.shape
        w_pack = w_pack.at[i, :o, :k].set(w)
        b_pack = b_pack.at[i, :o, 0].set(b)
    return w_pack, b_pack


def reference_forward(x, params):
    """Pure-JAX reference (matches the PyTorch module)."""
    h = x
    for i, (w, b) in enumerate(params):
        h = h @ w.T + b
        if i < 5:
            h = jnp.maximum(h, 0.0)
    return jax.nn.log_softmax(h, axis=-1)


if __name__ == "__main__":
    key = jax.random.PRNGKey(0)
    params = init_params(key)
    w_pack, b_pack = pack_params(params)

    # Small batch (single tile).
    key, kx = jax.random.split(key)
    B = 8
    x = jax.random.normal(kx, (B, 2), jnp.float32)
    out = jax.block_until_ready(net_forward(x, w_pack, b_pack))
    ref = reference_forward(x, params)
    assert out.shape == (B, 2)
    assert jnp.allclose(out, ref, atol=1e-5, rtol=1e-5), "mismatch vs reference (B=8)"

    # Multi-tile batch (exercises grid > 1 and padding slice-out).
    key, kx2 = jax.random.split(key)
    B2 = 300
    x2 = jax.random.normal(kx2, (B2, 2), jnp.float32)
    out2 = jax.block_until_ready(net_forward(x2, w_pack, b_pack, block_b=128))
    ref2 = reference_forward(x2, params)
    assert out2.shape == (B2, 2)
    assert jnp.allclose(out2, ref2, atol=1e-5, rtol=1e-5), "mismatch vs reference (B=300)"

    print("KERNEL_OK")
</pallas_src>

<mosaic_0001>
module attributes {stable_mosaic.version = 11 : i64} {
  func.func @mlp_kernel(%arg0: i32, %arg1: memref<2x128xf32, #tpu.memory_space<vmem>>, %arg2: memref<6x20x20xf32, #tpu.memory_space<vmem>>, %arg3: memref<6x20x1xf32, #tpu.memory_space<vmem>>, %arg4: memref<2x128xf32, #tpu.memory_space<vmem>>) attributes {dimension_semantics = [#tpu.dimension_semantics<parallel>], iteration_bounds = array<i64: 1>, scalar_prefetch = 0 : i64, scratch_operands = 0 : i64, tpu.core_type = #tpu.core_type<tc>, window_params = [{transform_indices = @transform_0, window_bounds = array<i64: 2, 128>}, {pipeline_mode = #tpu.pipeline_mode<synchronous>, transform_indices = @transform_1, window_bounds = array<i64: 6, 20, 20>}, {pipeline_mode = #tpu.pipeline_mode<synchronous>, transform_indices = @transform_2, window_bounds = array<i64: 6, 20, 1>}, {transform_indices = @transform_3, window_bounds = array<i64: 2, 128>}]} {
    %c0 = arith.constant 0 : index
    %c0_0 = arith.constant 0 : index
    %0 = vector.load %arg1[%c0, %c0_0] : memref<2x128xf32, #tpu.memory_space<vmem>>, vector<2x128xf32>
    %c0_1 = arith.constant 0 : index
    %c0_2 = arith.constant 0 : index
    %c0_3 = arith.constant 0 : index
    %1 = vector.load %arg2[%c0_1, %c0_2, %c0_3] : memref<6x20x20xf32, #tpu.memory_space<vmem>>, vector<1x20x20xf32>
    %2 = vector.shape_cast %1 : vector<1x20x20xf32> to vector<20x20xf32>
    %3 = vector.extract_strided_slice %2 {offsets = [0, 0], sizes = [20, 1], strides = [1, 1]} : vector<20x20xf32> to vector<20x1xf32>
    %4 = vector.extract_strided_slice %0 {offsets = [0, 0], sizes = [1, 128], strides = [1, 1]} : vector<2x128xf32> to vector<1x128xf32>
    %5 = vector.broadcast %3 : vector<20x1xf32> to vector<20x128xf32>
    %6 = vector.broadcast %4 : vector<1x128xf32> to vector<20x128xf32>
    %7 = arith.mulf %5, %6 : vector<20x128xf32>
    %8 = vector.extract_strided_slice %2 {offsets = [0, 1], sizes = [20, 1], strides = [1, 1]} : vector<20x20xf32> to vector<20x1xf32>
    %9 = vector.extract_strided_slice %0 {offsets = [1, 0], sizes = [1, 128], strides = [1, 1]} : vector<2x128xf32> to vector<1x128xf32>
    %10 = vector.broadcast %8 : vector<20x1xf32> to vector<20x128xf32>
    %11 = vector.broadcast %9 : vector<1x128xf32> to vector<20x128xf32>
    %12 = arith.mulf %10, %11 : vector<20x128xf32>
    %13 = arith.addf %7, %12 : vector<20x128xf32>
    %c0_4 = arith.constant 0 : index
    %c0_5 = arith.constant 0 : index
    %c0_6 = arith.constant 0 : index
    %14 = vector.load %arg3[%c0_4, %c0_5, %c0_6] : memref<6x20x1xf32, #tpu.memory_space<vmem>>, vector<1x20x1xf32>
    %15 = vector.shape_cast %14 : vector<1x20x1xf32> to vector<20x1xf32>
    %16 = vector.broadcast %15 : vector<20x1xf32> to vector<20x128xf32>
    %17 = arith.addf %13, %16 : vector<20x128xf32>
    %cst = arith.constant 0.000000e+00 : f32
    %18 = vector.broadcast %cst : f32 to vector<20x128xf32>
    %19 = arith.maximumf %17, %18 : vector<20x128xf32>
    %c1 = arith.constant 1 : index
    %c0_7 = arith.constant 0 : index
    %c0_8 = arith.constant 0 : index
    %20 = vector.load %arg2[%c1, %c0_7, %c0_8] : memref<6x20x20xf32, #tpu.memory_space<vmem>>, vector<1x20x20xf32>
    %21 = vector.shape_cast %20 : vector<1x20x20xf32> to vector<20x20xf32>
    %cst_9 = arith.constant dense<0.000000e+00> : vector<20x128xf32>
    %22 = tpu.matmul %21, %19, %cst_9 {dimension_numbers = #tpu.dot_dimension_numbers<[1], [0], [0], [1], [0, 0, 1, 1], [], []>} : vector<20x20xf32>, vector<20x128xf32>, vector<20x128xf32> -> vector<20x128xf32>
    %c1_10 = arith.constant 1 : index
    %c0_11 = arith.constant 0 : index
    %c0_12 = arith.constant 0 : index
    %23 = vector.load %arg3[%c1_10, %c0_11, %c0_12] : memref<6x20x1xf32, #tpu.memory_space<vmem>>, vector<1x20x1xf32>
    %24 = vector.shape_cast %23 : vector<1x20x1xf32> to vector<20x1xf32>
    %25 = vector.broadcast %24 : vector<20x1xf32> to vector<20x128xf32>
    %26 = arith.addf %22, %25 : vector<20x128xf32>
    %cst_13 = arith.constant 0.000000e+00 : f32
    %27 = vector.broadcast %cst_13 : f32 to vector<20x128xf32>
    %28 = arith.maximumf %26, %27 : vector<20x128xf32>
    %c2 = arith.constant 2 : index
    %c0_14 = arith.constant 0 : index
    %c0_15 = arith.constant 0 : index
    %29 = vector.load %arg2[%c2, %c0_14, %c0_15] : memref<6x20x20xf32, #tpu.memory_space<vmem>>, vector<1x20x20xf32>
    %30 = vector.shape_cast %29 : vector<1x20x20xf32> to vector<20x20xf32>
    %cst_16 = arith.constant dense<0.000000e+00> : vector<20x128xf32>
    %31 = tpu.matmul %30, %28, %cst_16 {dimension_numbers = #tpu.dot_dimension_numbers<[1], [0], [0], [1], [0, 0, 1, 1], [], []>} : vector<20x20xf32>, vector<20x128xf32>, vector<20x128xf32> -> vector<20x128xf32>
    %c2_17 = arith.constant 2 : index
    %c0_18 = arith.constant 0 : index
    %c0_19 = arith.constant 0 : index
    %32 = vector.load %arg3[%c2_17, %c0_18, %c0_19] : memref<6x20x1xf32, #tpu.memory_space<vmem>>, vector<1x20x1xf32>
    %33 = vector.shape_cast %32 : vector<1x20x1xf32> to vector<20x1xf32>
    %34 = vector.broadcast %33 : vector<20x1xf32> to vector<20x128xf32>
    %35 = arith.addf %31, %34 : vector<20x128xf32>
    %cst_20 = arith.constant 0.000000e+00 : f32
    %36 = vector.broadcast %cst_20 : f32 to vector<20x128xf32>
    %37 = arith.maximumf %35, %36 : vector<20x128xf32>
    %c3 = arith.constant 3 : index
    %c0_21 = arith.constant 0 : index
    %c0_22 = arith.constant 0 : index
    %38 = vector.load %arg2[%c3, %c0_21, %c0_22] : memref<6x20x20xf32, #tpu.memory_space<vmem>>, vector<1x20x20xf32>
    %39 = vector.shape_cast %38 : vector<1x20x20xf32> to vector<20x20xf32>
    %cst_23 = arith.constant dense<0.000000e+00> : vector<20x128xf32>
    %40 = tpu.matmul %39, %37, %cst_23 {dimension_numbers = #tpu.dot_dimension_numbers<[1], [0], [0], [1], [0, 0, 1, 1], [], []>} : vector<20x20xf32>, vector<20x128xf32>, vector<20x128xf32> -> vector<20x128xf32>
    %c3_24 = arith.constant 3 : index
    %c0_25 = arith.constant 0 : index
    %c0_26 = arith.constant 0 : index
    %41 = vector.load %arg3[%c3_24, %c0_25, %c0_26] : memref<6x20x1xf32, #tpu.memory_space<vmem>>, vector<1x20x1xf32>
    %42 = vector.shape_cast %41 : vector<1x20x1xf32> to vector<20x1xf32>
    %43 = vector.broadcast %42 : vector<20x1xf32> to vector<20x128xf32>
    %44 = arith.addf %40, %43 : vector<20x128xf32>
    %cst_27 = arith.constant 0.000000e+00 : f32
    %45 = vector.broadcast %cst_27 : f32 to vector<20x128xf32>
    %46 = arith.maximumf %44, %45 : vector<20x128xf32>
    %c4 = arith.constant 4 : index
    %c0_28 = arith.constant 0 : index
    %c0_29 = arith.constant 0 : index
    %47 = vector.load %arg2[%c4, %c0_28, %c0_29] : memref<6x20x20xf32, #tpu.memory_space<vmem>>, vector<1x20x20xf32>
    %48 = vector.shape_cast %47 : vector<1x20x20xf32> to vector<20x20xf32>
    %cst_30 = arith.constant dense<0.000000e+00> : vector<20x128xf32>
    %49 = tpu.matmul %48, %46, %cst_30 {dimension_numbers = #tpu.dot_dimension_numbers<[1], [0], [0], [1], [0, 0, 1, 1], [], []>} : vector<20x20xf32>, vector<20x128xf32>, vector<20x128xf32> -> vector<20x128xf32>
    %c4_31 = arith.constant 4 : index
    %c0_32 = arith.constant 0 : index
    %c0_33 = arith.constant 0 : index
    %50 = vector.load %arg3[%c4_31, %c0_32, %c0_33] : memref<6x20x1xf32, #tpu.memory_space<vmem>>, vector<1x20x1xf32>
    %51 = vector.shape_cast %50 : vector<1x20x1xf32> to vector<20x1xf32>
    %52 = vector.broadcast %51 : vector<20x1xf32> to vector<20x128xf32>
    %53 = arith.addf %49, %52 : vector<20x128xf32>
    %cst_34 = arith.constant 0.000000e+00 : f32
    %54 = vector.broadcast %cst_34 : f32 to vector<20x128xf32>
    %55 = arith.maximumf %53, %54 : vector<20x128xf32>
    %c5 = arith.constant 5 : index
    %c0_35 = arith.constant 0 : index
    %c0_36 = arith.constant 0 : index
    %56 = vector.load %arg2[%c5, %c0_35, %c0_36] : memref<6x20x20xf32, #tpu.memory_space<vmem>>, vector<1x20x20xf32>
    %57 = vector.shape_cast %56 : vector<1x20x20xf32> to vector<20x20xf32>
    %cst_37 = arith.constant dense<0.000000e+00> : vector<20x128xf32>
    %58 = tpu.matmul %57, %55, %cst_37 {dimension_numbers = #tpu.dot_dimension_numbers<[1], [0], [0], [1], [0, 0, 1, 1], [], []>} : vector<20x20xf32>, vector<20x128xf32>, vector<20x128xf32> -> vector<20x128xf32>
    %c5_38 = arith.constant 5 : index
    %c0_39 = arith.constant 0 : index
    %c0_40 = arith.constant 0 : index
    %59 = vector.load %arg3[%c5_38, %c0_39, %c0_40] : memref<6x20x1xf32, #tpu.memory_space<vmem>>, vector<1x20x1xf32>
    %60 = vector.shape_cast %59 : vector<1x20x1xf32> to vector<20x1xf32>
    %61 = vector.broadcast %60 : vector<20x1xf32> to vector<20x128xf32>
    %62 = arith.addf %58, %61 : vector<20x128xf32>
    %63 = vector.extract_strided_slice %62 {offsets = [0, 0], sizes = [1, 128], strides = [1, 1]} : vector<20x128xf32> to vector<1x128xf32>
    %64 = vector.extract_strided_slice %62 {offsets = [1, 0], sizes = [1, 128], strides = [1, 1]} : vector<20x128xf32> to vector<1x128xf32>
    %65 = arith.maximumf %63, %64 : vector<1x128xf32>
    %66 = arith.subf %63, %65 : vector<1x128xf32>
    %67 = math.exp %66 : vector<1x128xf32>
    %68 = arith.subf %64, %65 : vector<1x128xf32>
    %69 = math.exp %68 : vector<1x128xf32>
    %70 = arith.addf %67, %69 : vector<1x128xf32>
    %71 = math.log %70 : vector<1x128xf32>
    %72 = arith.addf %65, %71 : vector<1x128xf32>
    %73 = vector.extract_strided_slice %62 {offsets = [0, 0], sizes = [2, 128], strides = [1, 1]} : vector<20x128xf32> to vector<2x128xf32>
    %74 = vector.broadcast %72 : vector<1x128xf32> to vector<2x128xf32>
    %75 = arith.subf %73, %74 : vector<2x128xf32>
    %c0_41 = arith.constant 0 : index
    %c0_42 = arith.constant 0 : index
    %76 = vector.load %arg4[%c0_41, %c0_42] : memref<2x128xf32, #tpu.memory_space<vmem>>, vector<2x128xf32>
    tpu.vector_store %arg4[%c0_41, %c0_42], %75 {strides = array<i32>} : memref<2x128xf32, #tpu.memory_space<vmem>>, vector<2x128xf32>,
    return
  }
  func.func @transform_0(%arg0: i32) -> (i32, i32) {
    %c0_i32 = arith.constant 0 : i32
    %c0_i32_0 = arith.constant 0 : i32
    return %c0_i32, %arg0 : i32, i32
  }
  func.func @transform_1(%arg0: i32) -> (i32, i32, i32) {
    %c0_i32 = arith.constant 0 : i32
    %c0_i32_0 = arith.constant 0 : i32
    %c0_i32_1 = arith.constant 0 : i32
    %c0_i32_2 = arith.constant 0 : i32
    return %c0_i32, %c0_i32_0, %c0_i32_1 : i32, i32, i32
  }
  func.func @transform_2(%arg0: i32) -> (i32, i32, i32) {
    %c0_i32 = arith.constant 0 : i32
    %c0_i32_0 = arith.constant 0 : i32
    %c0_i32_1 = arith.constant 0 : i32
    %c0_i32_2 = arith.constant 0 : i32
    return %c0_i32, %c0_i32_0, %c0_i32_1 : i32, i32, i32
  }
  func.func @transform_3(%arg0: i32) -> (i32, i32) {
    %c0_i32 = arith.constant 0 : i32
    %c0_i32_0 = arith.constant 0 : i32
    return %c0_i32, %arg0 : i32, i32
  }
}

</mosaic_0001>

<bundles_post_ra>
// kernel: net_forward.1
= control target key start
LH: loop header
LB: loop body
LE: loop exit
PB: predicated region body
PF: predicated region fallthrough
CT: control target
= control target key end

     0   :  { %v891_v0 = vmov 1   ;;  %v892_v1 = vmov 0   ;;  %v893_v8 = vmov 0.0|0.0   ;;  %vm894_vm0 = vmmov 0   ;;  %s1095_s1 = inlined_call_operand.vmem [shape: f32[6,20,20], index: 1, kind: input, shape index: {}]   ;;  %s1096_s2 = inlined_call_operand.vmem [shape: f32[6,20,1], index: 2, kind: input, shape index: {}]   ;;  %s1097_s0 = inlined_call_operand.vmem [shape: f32[2,128], index: 0, kind: input, shape index: {}]   ;;  %s1098_s3 = inlined_call_operand.vmem [shape: f32[2,128], index: 3, kind: output, shape index: {}]  }
   0x1   :  { %881 = vset.pattern.permute.xlu1 %v891_v0  ;;  %880 = vset.pattern.permute.xlu0 %v892_v1  ;;  %v15_v2 = vld [vmem:[%s1095_s1] sm:$0xff]  ;;  %v16_v3 = vld [vmem:[%s1095_s1 + $0x8] sm:$0xff]  ;;  %v17_v6 = vld [vmem:[%s1095_s1 + $0x10] sm:$0xf]  ;;  %v895_v11 = vmov 0.0   ;;  %v33_v23 = vlaneseq  ;;  %vm119_vm1 = vcmask 1043456  }
   0x2   :  { %41 = vperm.xlu1 %881, %v15_v2   ;;  %20 = vperm.xlu0 %880, %v15_v2   ;;  %v62_v4 = vld [vmem:[%s1096_s2] sm:$0xff]  ;;  %v63_v5 = vld [vmem:[%s1096_s2 + $0x8] sm:$0xff]  ;;  %v64_v7 = vld [vmem:[%s1096_s2 + $0x10] sm:$0xf]  ;;  %vm109_vm2 = vcmask 162816  }
   0x3   :  { %856 = vmatprep.subr.bf16.mxu0 %v893_v8  ;;  %871 = vmatprep.subr.bf16.mxu1 %v893_v8  ;;  %v705_v9 = vld [vmem:[%s1096_s2 + $0x20] sm:$0xff]  ;;  %v714_v10 = vld [vmem:[%s1096_s2 + $0x30] sm:$0xff]  ;;  %v704_v16 = vld [vmem:[%s1096_s2 + $0x18] sm:$0xff]  ;;  %v979_v24 = vshrl.u32 %v33_v23, 7 }
   0x4   :  { %787 = vmatprep.mubr.msk.f32.mxu0 %vm894_vm0, %v895_v11  ;;  %793 = vmatprep.mubr.msk.f32.mxu1 %vm894_vm0, %v895_v11  ;;  %v716_v12 = vld [vmem:[%s1096_s2 + $0x40] sm:$0xf]  ;;  %v725_v13 = vld [vmem:[%s1096_s2 + $0x50] sm:$0xff]  ;;  %v706_v17 = vld [vmem:[%s1096_s2 + $0x28] sm:$0xf] }
   0x5   :  { %v734_v14 = vld [vmem:[%s1096_s2 + $0x60] sm:$0xff]  ;;  %v736_v15 = vld [vmem:[%s1096_s2 + $0x70] sm:$0xf]  ;;  %v715_v18 = vld [vmem:[%s1096_s2 + $0x38] sm:$0xff]  ;;  %v54_v25 = vsub.s32 1, %v979_v24  ;;  %v35_v26 = vsub.s32 0, %v979_v24 }
   0x6   :  { %45 = vperm.xlu1 %881, %v16_v3   ;;  %25 = vperm.xlu0 %880, %v16_v3   ;;  %v724_v19 = vld [vmem:[%s1096_s2 + $0x48] sm:$0xff]  ;;  %v726_v20 = vld [vmem:[%s1096_s2 + $0x58] sm:$0xf]  ;;  %v14_v27 = vld [vmem:[%s1097_s0] sm:$0x3] }
   0x7   :  { %v735_v21 = vld [vmem:[%s1096_s2 + $0x68] sm:$0xff]  ;;  %v744_v22 = vld [vmem:[%s1096_s2 + $0x78] sm:$0xff]  ;;  %v55_v28 = vrot.slane %v14_v27, %v54_v25  ;;  %v36_v29 = vrot.slane %v14_v27, %v35_v26  ;;  %v702_v57 = vld [vmem:[%s1095_s1 + $0x20] sm:$0xff] }
   0x8   :  { %v701_v55 = vld [vmem:[%s1095_s1 + $0x18] sm:$0xff]  ;;  %v703_v56 = vld [vmem:[%s1095_s1 + $0x28] sm:$0xf] }
   0xa   :  { %882 = vset.pattern.permute.xlu1 %v892_v1  ;;  %67 = vperm.xlu0 %880, %v62_v4  }
   0xb   :  { %72 = vperm.xlu1 %882, %v63_v5  }
   0xe   :  { %30 = vperm.xlu0 %880, %v17_v6  }
   0xf   :  { %883 = vset.pattern.permute.xlu1 %v891_v0 }
  0x10   :  { %49 = vperm.xlu1 %883, %v17_v6  }
  0x12   :  { %77 = vperm.xlu0 %880, %v64_v7  }
  0x14   :  { %884 = vset.pattern.permute.xlu1 %v892_v1 }
  0x15   :  { %96 = vperm.xlu1 %884, %v704_v16  }
  0x16   :  { %101 = vperm.xlu0 %880, %v705_v9  }
  0x19   :  { %106 = vperm.xlu1 %884, %v706_v17  }
  0x1a   :  { %216 = vperm.xlu0 %880, %v714_v10  }
  0x1d   :  { %221 = vperm.xlu1 %884, %v715_v18  }
  0x1e   :  { %226 = vperm.xlu0 %880, %v716_v12   ;;  %v711_v12 = vld [vmem:[%s1095_s1 + $0x30] sm:$0xff] }
  0x21   :  { %334 = vperm.xlu1 %884, %v724_v19  }
  0x22   :  { %339 = vperm.xlu0 %880, %v725_v13   ;;  %v712_v13 = vld [vmem:[%s1095_s1 + $0x38] sm:$0xff] }
  0x25   :  { %344 = vperm.xlu1 %884, %v726_v20  }
  0x26   :  { %452 = vperm.xlu0 %880, %v734_v14   ;;  %v713_v14 = vld [vmem:[%s1095_s1 + $0x40] sm:$0xf] }
  0x29   :  { %457 = vperm.xlu1 %884, %v735_v21  }
  0x2a   :  { %462 = vperm.xlu0 %880, %v736_v15  }
  0x2d   :  { %570 = vperm.xlu1 %884, %v744_v22  }
  0x81   :  { %v42_v30 = vpop.permute.xlu1 %41  ;;  %v21_v31 = vpop.permute.xlu0 %20 }
  0x82   :  { %v56_v32 = vmul.f32 %v55_v28, %v42_v30  ;;  %v37_v33 = vmul.f32 %v36_v29, %v21_v31 }
  0x84   :  { %v59_v38 = vadd.f32 %v56_v32, %v37_v33  ;;  %v721_v33 = vld [vmem:[%s1095_s1 + $0x48] sm:$0xff] }
  0x85   :  { %v46_v34 = vpop.permute.xlu1 %45  ;;  %v26_v35 = vpop.permute.xlu0 %25 }
  0x86   :  { %v57_v36 = vmul.f32 %v55_v28, %v46_v34  ;;  %v38_v37 = vmul.f32 %v36_v29, %v26_v35  ;;  %v722_v34 = vld [vmem:[%s1095_s1 + $0x50] sm:$0xff]  ;;  %v723_v35 = vld [vmem:[%s1095_s1 + $0x58] sm:$0xf] }
  0x88   :  { %v60_v39 = vadd.f32 %v57_v36, %v38_v37 }
  0x89   :  { %v68_v40 = vpop.permute.xlu0 %67 }
  0x8a   :  { %v80_v41 = vadd.f32 %v68_v40, %v59_v38  ;;  %v73_v42 = vpop.permute.xlu1 %72 }
  0x8b   :  { %v81_v43 = vadd.f32 %v73_v42, %v60_v39 }
  0x8c   :  { %v83_v44 = vmax.f32 %v80_v41, 0.0 }
  0x8d   :  { %v84_v45 = vmax.f32 %v81_v43, 0.0  ;;  %v31_v46 = vpop.permute.xlu0 %30 }
  0x8e   :  { %v39_v49 = vmul.f32 %v36_v29, %v31_v46 }
  0x8f   :  { %v50_v47 = vpop.permute.xlu1 %49  ;;  %v857_v48 = vpack.c.bf16 %v84_v45, %v83_v44 }
  0x90   :  { %v58_v50 = vmul.f32 %v55_v28, %v50_v47 }
  0x91   :  { %858 = vmatpush3.bf16.msra.mxu0 %v857_v48  ;;  %873 = vmatpush3.bf16.msra.mxu1 %v857_v48  ;;  %v78_v52 = vpop.permute.xlu0 %77 }
  0x92   :  { %v61_v51 = vadd.f32 %v58_v50, %v39_v49  ;;  %785 = vmatprep.subr.mxu0 %v895_v11  ;;  %872 = vmatprep.subr.mxu1 %v895_v11 }
  0x94   :  { %v82_v53 = vadd.f32 %v78_v52, %v61_v51  ;;  %v97_v62 = vpop.permute.xlu1 %96  ;;  %v731_v51 = vld [vmem:[%s1095_s1 + $0x60] sm:$0xff]  ;;  %v732_v52 = vld [vmem:[%s1095_s1 + $0x68] sm:$0xff] }
  0x95   :  { %v102_v0 = vpop.permute.xlu0 %101 }
  0x96   :  { %v85_v54 = vmax.f32 %v82_v53, 0.0  ;;  %v733_v53 = vld [vmem:[%s1095_s1 + $0x70] sm:$0xf] }
  0x98   :  { %786 = vmatpush3.msk.msra.mxu0 %vm119_vm1, %v85_v54  ;;  %874 = vmatpush3.msk.msra.mxu1 %vm119_vm1, %v85_v54  ;;  %v107_v6 = vpop.permute.xlu1 %106 }
  0x99   :  { %788 = vmatmul.mubr.msk.f32.vlgmr.msra.gmra.mrb[0].mxu0 %vm109_vm2, %v701_v55  ;;  %794 = vmatmul.mubr.msk.f32.vlgmr.msra.gmra.mrb[0].mxu1 %vm109_vm2, %v703_v56  ;;  %v217_v17 = vpop.permute.xlu0 %216 }
  0x9a   :  { %790 = vmatprep.mubr.msk.f32.mxu0 %vm894_vm0, %v895_v11  ;;  %859 = vmatprep.subr.bf16.mxu1 %v893_v8 }
  0x9b   :  { %802 = vmatprep.mubr.msk.f32.mxu1 %vm894_vm0, %v895_v11  ;;  %862 = vmatprep.subr.bf16.mxu0 %v893_v8 }
  0x9c   :  { %v222_v19 = vpop.permute.xlu1 %221 }
  0x9d   :  { %791 = vmatmul.mubr.msk.f32.gmra.mrb[2].mxu0 %vm109_vm2, %v702_v57  ;;  %v227_v27 = vpop.permute.xlu0 %226 }
  0x9e   :  { %817 = vmatprep.mubr.msk.f32.mxu0 %vm894_vm0, %v895_v11 }
  0xa0   :  { %v335_v37 = vpop.permute.xlu1 %334 }
  0xa1   :  { %v340_v39 = vpop.permute.xlu0 %339 }
  0xa4   :  { %v345_v45 = vpop.permute.xlu1 %344 }
  0xa5   :  { %v453_v56 = vpop.permute.xlu0 %452 }
 0x16c   :  { %v189_v58 = vpop.f32.mrb[0].mxu0  ;;  %v199_v59 = vpop.f32.mrb[0].mxu1 }
 0x16d   :  { %v789_v60 = vpop.f32.mrb[1].mxu0  ;;  %v795_v61 = vpop.f32.mrb[1].mxu1  ;;  %v190_v63 = vadd.f32 %v189_v58, %v97_v62  ;;  %v200_v9 = vadd.f32 %v199_v59, %v107_v6  ;;  %v741_v6 = vld [vmem:[%s1095_s1 + $0x78] sm:$0xff] }
 0x16e   :  { %v458_v58 = vpop.permute.xlu1 %457 }
 0x16f   :  { %v203_v4 = vmax.f32 %v190_v63, 0.0  ;;  %v205_v10 = vmax.f32 %v200_v9, 0.0  ;;  %v743_v9 = vld [vmem:[%s1095_s1 + $0x88] sm:$0xf] }
 0x170   :  { %v194_v1 = vpop.f32.mrb[2].mxu0 }
 0x171   :  { %v195_v2 = vadd.f32 %v194_v1, %v102_v0  ;;  %v792_v3 = vpop.f32.mrb[3].mxu0  ;;  %v463_v0 = vpop.permute.xlu0 %462 }
 0x173   :  { %v204_v5 = vmax.f32 %v195_v2, 0.0 }
 0x175   :  { %v860_v7 = vpack.c.bf16 %v204_v5, %v203_v4 }
 0x177   :  { %861 = vmatpush3.bf16.msra.mxu1 %v860_v7  ;;  %v742_v7 = vld [vmem:[%s1095_s1 + $0x80] sm:$0xff] }
 0x178   :  { %800 = vmatprep.subr.mxu1 %v895_v11 }
 0x17b   :  { %801 = vmatpush3.msk.msra.mxu1 %vm119_vm1, %v205_v10  ;;  %v571_v10 = vpop.permute.xlu1 %570 }
 0x17c   :  { %803 = vmatmul.mubr.msk.f32.vlgmr.msra.gmra.mrb[2].mxu1 %vm109_vm2, %v711_v12  ;;  %865 = vmatprep.subr.bf16.mxu1 %v893_v8 }
 0x17d   :  { %805 = vmatprep.mubr.msk.f32.mxu1 %vm894_vm0, %v895_v11 }
 0x180   :  { %806 = vmatmul.mubr.msk.f32.gmra.mrb[4].mxu1 %vm109_vm2, %v712_v13 }
 0x181   :  { %808 = vmatprep.mubr.msk.f32.mxu1 %vm894_vm0, %v895_v11 }
 0x184   :  { %809 = vmatmul.mubr.msk.f32.gmra.mrb[6].mxu1 %vm109_vm2, %v713_v14 }
 0x185   :  { %832 = vmatprep.mubr.msk.f32.mxu1 %vm894_vm0, %v895_v11 }
 0x24f   :  { %v307_v15 = vpop.f32.mrb[2].mxu1 }
 0x250   :  { %v804_v16 = vpop.f32.mrb[3].mxu1  ;;  %v308_v18 = vadd.f32 %v307_v15, %v217_v17 }
 0x252   :  { %v321_v23 = vmax.f32 %v308_v18, 0.0 }
 0x253   :  { %v312_v20 = vpop.f32.mrb[4].mxu1 }
 0x254   :  { %v313_v21 = vadd.f32 %v312_v20, %v222_v19  ;;  %v807_v22 = vpop.f32.mrb[5].mxu1 }
 0x256   :  { %v322_v25 = vmax.f32 %v313_v21, 0.0 }
 0x257   :  { %v317_v28 = vpop.f32.mrb[6].mxu1 }
 0x258   :  { %v863_v29 = vpack.c.bf16 %v322_v25, %v321_v23  ;;  %v318_v30 = vadd.f32 %v317_v28, %v227_v27  ;;  %v810_v31 = vpop.f32.mrb[7].mxu1 }
 0x25a   :  { %864 = vmatpush3.bf16.msra.mxu0 %v863_v29  ;;  %v323_v32 = vmax.f32 %v318_v30, 0.0 }
 0x25b   :  { %815 = vmatprep.subr.mxu0 %v895_v11 }
 0x25e   :  { %816 = vmatpush3.msk.msra.mxu0 %vm119_vm1, %v323_v32 }
 0x25f   :  { %818 = vmatmul.mubr.msk.f32.vlgmr.msra.gmra.mrb[4].mxu0 %vm109_vm2, %v721_v33  ;;  %868 = vmatprep.subr.bf16.mxu0 %v893_v8 }
 0x260   :  { %820 = vmatprep.mubr.msk.f32.mxu0 %vm894_vm0, %v895_v11 }
 0x263   :  { %821 = vmatmul.mubr.msk.f32.gmra.mrb[6].mxu0 %vm109_vm2, %v722_v34 }
 0x264   :  { %823 = vmatprep.mubr.msk.f32.mxu0 %vm894_vm0, %v895_v11 }
 0x267   :  { %824 = vmatmul.mubr.msk.f32.gmra.mrb[8].mxu0 %vm109_vm2, %v723_v35 }
 0x268   :  { %847 = vmatprep.mubr.msk.f32.mxu0 %vm894_vm0, %v895_v11 }
 0x332   :  { %v425_v8 = vpop.f32.mrb[4].mxu0 }
 0x333   :  { %v819_v36 = vpop.f32.mrb[5].mxu0  ;;  %v426_v38 = vadd.f32 %v425_v8, %v335_v37 }
 0x335   :  { %v439_v43 = vmax.f32 %v426_v38, 0.0 }
 0x336   :  { %v430_v40 = vpop.f32.mrb[6].mxu0 }
 0x337   :  { %v431_v41 = vadd.f32 %v430_v40, %v340_v39  ;;  %v822_v42 = vpop.f32.mrb[7].mxu0 }
 0x339   :  { %v440_v44 = vmax.f32 %v431_v41, 0.0 }
 0x33a   :  { %v435_v46 = vpop.f32.mrb[8].mxu0 }
 0x33b   :  { %v866_v47 = vpack.c.bf16 %v440_v44, %v439_v43  ;;  %v436_v48 = vadd.f32 %v435_v46, %v345_v45  ;;  %v825_v49 = vpop.f32.mrb[9].mxu0 }
 0x33d   :  { %867 = vmatpush3.bf16.msra.mxu1 %v866_v47  ;;  %v441_v50 = vmax.f32 %v436_v48, 0.0 }
 0x33e   :  { %830 = vmatprep.subr.mxu1 %v895_v11 }
 0x341   :  { %831 = vmatpush3.msk.msra.mxu1 %vm119_vm1, %v441_v50 }
 0x342   :  { %833 = vmatmul.mubr.msk.f32.vlgmr.msra.gmra.mrb[8].mxu1 %vm109_vm2, %v731_v51 }
 0x343   :  { %835 = vmatprep.mubr.msk.f32.mxu1 %vm894_vm0, %v895_v11 }
 0x346   :  { %836 = vmatmul.mubr.msk.f32.gmra.mrb[10].mxu1 %vm109_vm2, %v732_v52 }
 0x347   :  { %838 = vmatprep.mubr.msk.f32.mxu1 %vm894_vm0, %v895_v11 }
 0x34a   :  { %839 = vmatmul.mubr.msk.f32.gmra.mrb[12].mxu1 %vm109_vm2, %v733_v53 }
 0x415   :  { %v543_v54 = vpop.f32.mrb[8].mxu1 }
 0x416   :  { %v834_v55 = vpop.f32.mrb[9].mxu1  ;;  %v544_v57 = vadd.f32 %v543_v54, %v453_v56 }
 0x418   :  { %v557_v62 = vmax.f32 %v544_v57, 0.0 }
 0x419   :  { %v548_v59 = vpop.f32.mrb[10].mxu1 }
 0x41a   :  { %v549_v60 = vadd.f32 %v548_v59, %v458_v58  ;;  %v837_v61 = vpop.f32.mrb[11].mxu1 }
 0x41c   :  { %v558_v63 = vmax.f32 %v549_v60, 0.0 }
 0x41d   :  { %v553_v1 = vpop.f32.mrb[12].mxu1 }
 0x41e   :  { %v869_v2 = vpack.c.bf16 %v558_v63, %v557_v62  ;;  %v554_v3 = vadd.f32 %v553_v1, %v463_v0  ;;  %v840_v4 = vpop.f32.mrb[13].mxu1 }
 0x420   :  { %870 = vmatpush3.bf16.msra.mxu0 %v869_v2  ;;  %v559_v5 = vmax.f32 %v554_v3, 0.0 }
 0x421   :  { %845 = vmatprep.subr.mxu0 %v895_v11 }
 0x424   :  { %846 = vmatpush3.msk.msra.mxu0 %vm119_vm1, %v559_v5 }
 0x425   :  { %848 = vmatmul.mubr.msk.f32.vlgmr.msra.gmra.mrb[10].mxu0 %vm109_vm2, %v741_v6 }
 0x426   :  { %850 = vmatprep.mubr.msk.f32.mxu0 %vm894_vm0, %v895_v11 }
 0x429   :  { %851 = vmatmul.mubr.msk.f32.gmra.mrb[12].mxu0 %vm109_vm2, %v742_v7 }
 0x42a   :  { %853 = vmatprep.mubr.msk.f32.mxu0 %vm894_vm0, %v895_v11 }
 0x42d   :  { %854 = vmatmul.mubr.msk.f32.gmra.mrb[14].mxu0 %vm109_vm2, %v743_v9 }
 0x4f8   :  { %v659_v12 = vpop.f32.mrb[10].mxu0 }
 0x4f9   :  { %v660_v13 = vadd.f32 %v659_v12, %v571_v10  ;;  %v849_v14 = vpop.f32.mrb[11].mxu0 }
 0x4fb   :  { %v672_v15 = vrot.slane %v660_v13, 1 }
 0x4fc   :  { %v664_v16 = vpop.f32.mrb[12].mxu0 }
 0x4fd   :  { %v674_v17 = vmax.f32 %v660_v13, %v672_v15  ;;  %v852_v18 = vpop.f32.mrb[13].mxu0 }
 0x4ff   :  { %v675_v19 = vsub.f32 %v660_v13, %v674_v17  ;;  %v679_v20 = vrot.slane %v674_v17, 7 }
 0x500   :  { %v668_v21 = vpop.f32.mrb[14].mxu0 }
 0x501   :  { %v681_v22 = vsub.f32 %v660_v13, %v679_v20  ;;  %v855_v23 = vpop.f32.mrb[15].mxu0  ;;  %v676_v11 = vmul.f32 1.442695, %v675_v19 }
 0x503   :  { %v682_v25 = vmul.f32 1.442695, %v681_v22 }
 0x505   :  { %885 = vpow2.f32 %v682_v25 }
 0x506   :  { %887 = vpow2.f32 %v676_v11 }
 0x50f   :  { %v886_v27 = vpop.eup %885 }
 0x510   :  { %v685_v28 = vrot.slane %v886_v27, 1  ;;  %v888_v29 = vpop.eup %887 }
 0x512   :  { %v687_v30 = vadd.f32 %v888_v29, %v685_v28 }
 0x514   :  { %889 = vlog2.f32 %v687_v30 }
 0x51e   :  { %v890_v31 = vpop.eup %889 }
 0x51f   :  { %v689_v32 = vmul.f32 0.6931472, %v890_v31 }
 0x521   :  { %v690_v33 = vadd.f32 %v689_v32, %v674_v17 }
 0x523   :  { %v694_v34 = vrot.slane %v690_v33, %v35_v26 }
 0x525   :  { %v695_v35 = vsub.f32 %v660_v13, %v694_v34 }
 0x527   :  { %696 = vst [vmem:[%s1098_s3] sm:$0x3] %v695_v35 }

</bundles_post_ra>
